<compile_context>
chip_gen: v6e
topology: v6e:2x2x1
jax: 0.10.0
libtpu: 0.0.40
codegen_flags: <defaults>
</compile_context>

<pallas_src>
import functools

import jax
import jax.numpy as jnp
from jax import lax
from jax.experimental import pallas as pl
from jax.experimental.pallas import tpu as pltpu


_VMEM_CAP = 48 << 20          # conservative cap: fits v7x's 64 MiB/TC with headroom
_ACC_VREG_BUDGET = 32         # vregs allowed for the two loop-carried accumulators


def _round_up(n, m):
    return ((n + m - 1) // m) * m


def _cdiv(a, b):
    return (a + b - 1) // b


def _vmem_need_bytes(cin, bt, ct, mp_t):
    """Sublane/lane-padded VMEM footprint of one grid step (double-buffered)."""
    x_blk = 2 * cin * _round_up(bt, 8) * mp_t * 4
    w_blk = 2 * cin * _round_up(ct, 8) * mp_t * 4
    o_blk = 2 * bt * _round_up(ct, 8) * mp_t * 4
    # x / weights / out all double-buffered by the pipeline, + compiler headroom.
    return 2 * (x_blk + w_blk + o_blk) + (4 << 20)


def _pick_tiles(batch, cout, cin, mp):
    """Choose (bt, ct, mp_t, batch_p, cout_p).

    mp is the padded mode count (multiple of 128).  Tiles obey the (8, 128)
    rule, keep the register accumulators within _ACC_VREG_BUDGET vregs, keep
    the per-step VMEM footprint under _VMEM_CAP, and try to give the grid >= 2
    steps (pipelining; second TensorCore on v7x).
    """
    # batch tile: full extent when small, else pad to a multiple of 8, tile by 8.
    if batch <= 8:
        batch_p, bt = batch, batch
    else:
        batch_p, bt = _round_up(batch, 8), 8
    # cout tile: same policy (sublane-aligned tiles, >=2 steps when possible).
    if cout <= 8:
        cout_p, ct = cout, cout
    else:
        cout_p, ct = _round_up(cout, 8), 8

    # mode tile: largest divisor of mp (multiple of 128) that keeps the two
    # (bt, ct, mp_t) f32 accumulators in registers and the block under the cap.
    k = mp // 128
    acc_vregs_per_lane_blk = 2 * bt * _cdiv(ct, 8)
    max_lane_blks = max(1, _ACC_VREG_BUDGET // acc_vregs_per_lane_blk)
    divisors = [d for d in range(k, 0, -1) if k % d == 0]

    mp_t = None
    for d in divisors:
        if d <= max_lane_blks and _vmem_need_bytes(cin, bt, ct, d * 128) <= _VMEM_CAP:
            mp_t = d * 128
            break
    if mp_t is None:
        raise ValueError(
            "SpectralConv2d_fast Pallas kernel: cannot tile within the "
            f"{_VMEM_CAP >> 20} MiB VMEM budget (Cin={cin}, bt={bt}, ct={ct}); "
            "reduce in_channels per call.")

    # If the whole grid collapses to one step there is no DMA/compute overlap
    # and (on v7x) only one TensorCore works -- split the mode axis if possible.
    n_grid = (mp // mp_t) * (cout_p // ct) * (batch_p // bt)
    if n_grid == 1 and k >= 2:
        for d in divisors:
            if d < k and d <= max_lane_blks:
                mp_t = d * 128
                break
    return bt, ct, mp_t, batch_p, cout_p


def _spectral_mul_kernel(x_ref, w_ref, o_ref):
    """out[b,o,m] = sum_i x[b,i,m] * w[i,o,m]   (complex multiply, per mode m).

    x_ref : (2, Cin, bt, mp_t)   real/imag planes of the input modes
    w_ref : (2, Cin, ct, mp_t)   real/imag planes of the weights
    o_ref : (2, bt, ct, mp_t)    real/imag planes of the output modes
    """
    cin = x_ref.shape[1]
    bt = x_ref.shape[2]
    ct = w_ref.shape[2]
    mp_t = x_ref.shape[3]

    def body(i, acc):
        acc_r, acc_i = acc
        xr = x_ref[0, i]                  # (bt, mp_t)
        xi = x_ref[1, i]
        wr = w_ref[0, i]                  # (ct, mp_t)
        wi = w_ref[1, i]
        xr3 = xr[:, None, :]              # (bt, 1, mp_t)
        xi3 = xi[:, None, :]
        wr3 = wr[None, :, :]              # (1, ct, mp_t)
        wi3 = wi[None, :, :]
        # (a + ib)(c + id) = (ac - bd) + i(ad + bc)
        acc_r = acc_r + (xr3 * wr3 - xi3 * wi3)
        acc_i = acc_i + (xr3 * wi3 + xi3 * wr3)
        return acc_r, acc_i

    zeros = jnp.zeros((bt, ct, mp_t), jnp.float32)
    acc_r, acc_i = lax.fori_loop(0, cin, body, (zeros, zeros),
                                 unroll=True if cin <= 16 else 4)

    # Single final store per output plane (v5e has a single vector-store slot).
    o_ref[0, ...] = acc_r
    o_ref[1, ...] = acc_i


def spectral_mul_pallas(x_ri, w_ri, *, bt, ct, mp_t):
    """Complex channel contraction over concatenated Fourier modes.

    x_ri : float32 (2, Cin, B_p, Mp)      stacked real/imag input modes
    w_ri : float32 (2, Cin, Cout_p, Mp)   stacked real/imag weights
    returns float32 (2, B_p, Cout_p, Mp)
    """
    _, cin, batch_p, mp = x_ri.shape
    cout_p = w_ri.shape[2]
    grid = (mp // mp_t, cout_p // ct, batch_p // bt)   # batch innermost

    need = _vmem_need_bytes(cin, bt, ct, mp_t)
    if need > _VMEM_CAP:
        raise ValueError(
            f"per-step VMEM footprint {need >> 20} MiB exceeds the "
            f"{_VMEM_CAP >> 20} MiB budget; re-tile instead of clamping.")
    vmem_limit = int(min(max(need, 16 << 20), _VMEM_CAP))

    return pl.pallas_call(
        _spectral_mul_kernel,
        out_shape=jax.ShapeDtypeStruct((2, batch_p, cout_p, mp), jnp.float32),
        grid=grid,
        in_specs=[
            # x tile: depends on (mode, batch) only.
            pl.BlockSpec((2, cin, bt, mp_t), lambda mo, co, ba: (0, 0, ba, mo)),
            # weight tile: depends on (mode, cout) only -> constant across the
            # innermost batch axis, so it stays resident in VMEM between steps.
            pl.BlockSpec((2, cin, ct, mp_t), lambda mo, co, ba: (0, 0, co, mo)),
        ],
        out_specs=pl.BlockSpec((2, bt, ct, mp_t),
                               lambda mo, co, ba: (0, ba, co, mo)),
        compiler_params=pltpu.CompilerParams(
            dimension_semantics=("parallel", "parallel", "parallel"),
            vmem_limit_bytes=vmem_limit,
        ),
    )(x_ri, w_ri)


@functools.partial(jax.jit, static_argnames=("modes1", "modes2"))
def spectral_conv2d_fast(x, weights1, weights2, *, modes1, modes2):
    """Forward pass of SpectralConv2d_fast.

    x        : float32 (B, Cin, H, W)   (NCHW, same as PyTorch)
    weights1 : complex64 (Cin, Cout, modes1, modes2)
    weights2 : complex64 (Cin, Cout, modes1, modes2)
    returns  : float32 (B, Cout, H, W)
    """
    B, Cin, H, W = x.shape
    Cout = weights1.shape[1]
    Wf = W // 2 + 1
    if modes2 > Wf or 2 * modes1 > H:
        raise ValueError(
            f"modes1={modes1}, modes2={modes2} out of range for spatial size "
            f"({H}, {W}); need modes2 <= W//2+1 and 2*modes1 <= H.")
    M = modes1 * modes2
    Mtot = 2 * M                                  # both Fourier corners, concatenated
    Mp = _round_up(Mtot, 128)                     # lane-dense padded mode axis

    # TODO(synk): rfft2 / irfft2 have no Pallas equivalent; they stay in XLA.
    x_ft = jnp.fft.rfft2(x)                       # (B, Cin, H, Wf) complex64

    # --- pack inputs: concat the two corners along modes, stack real/imag ----
    low = x_ft[:, :, :modes1, :modes2].reshape(B, Cin, M)
    high = x_ft[:, :, H - modes1:, :modes2].reshape(B, Cin, M)
    xm = jnp.swapaxes(jnp.concatenate([low, high], axis=-1), 0, 1)   # (Cin, B, 2M)
    x_ri = jnp.stack([xm.real, xm.imag], axis=0).astype(jnp.float32)

    wm = jnp.concatenate([weights1.reshape(Cin, Cout, M),
                          weights2.reshape(Cin, Cout, M)], axis=-1)  # (Cin, Cout, 2M)
    w_ri = jnp.stack([wm.real, wm.imag], axis=0).astype(jnp.float32)

    # --- tiling + padding (batch / cout to multiples of 8, modes to 128) -----
    bt, ct, mp_t, B_p, Cout_p = _pick_tiles(B, Cout, Cin, Mp)
    x_ri = jnp.pad(x_ri, ((0, 0), (0, 0), (0, B_p - B), (0, Mp - Mtot)))
    w_ri = jnp.pad(w_ri, ((0, 0), (0, 0), (0, Cout_p - Cout), (0, Mp - Mtot)))

    # --- Pallas kernel: complex contraction over Cin --------------------------
    out_ri = spectral_mul_pallas(x_ri, w_ri, bt=bt, ct=ct, mp_t=mp_t)

    # --- unpack and scatter back into the spectrum ----------------------------
    out_c = (out_ri[0, :B, :Cout, :Mtot]
             + 1j * out_ri[1, :B, :Cout, :Mtot]).astype(jnp.complex64)
    low_o = out_c[:, :, :M].reshape(B, Cout, modes1, modes2)
    high_o = out_c[:, :, M:].reshape(B, Cout, modes1, modes2)

    out_ft = jnp.zeros((B, Cout, H, Wf), jnp.complex64)
    out_ft = out_ft.at[:, :, :modes1, :modes2].set(low_o)
    out_ft = out_ft.at[:, :, H - modes1:, :modes2].set(high_o)

    return jnp.fft.irfft2(out_ft, s=(H, W)).astype(jnp.float32)


def _ref_forward(x, w1, w2, modes1, modes2):
    """Pure-JAX reference of the same forward pass (for sanity checking)."""
    B, Cin, H, W = x.shape
    Cout = w1.shape[1]
    x_ft = jnp.fft.rfft2(x)
    out_ft = jnp.zeros((B, Cout, H, W // 2 + 1), jnp.complex64)
    out_ft = out_ft.at[:, :, :modes1, :modes2].set(
        jnp.einsum('bixy,ioxy->boxy', x_ft[:, :, :modes1, :modes2], w1))
    out_ft = out_ft.at[:, :, -modes1:, :modes2].set(
        jnp.einsum('bixy,ioxy->boxy', x_ft[:, :, -modes1:, :modes2], w2))
    return jnp.fft.irfft2(out_ft, s=(H, W)).astype(jnp.float32)


if __name__ == "__main__":
    def run_case(key, B, Cin, Cout, H, W, modes1, modes2):
        kx, kw1r, kw1i, kw2r, kw2i = jax.random.split(key, 5)
        x = jax.random.normal(kx, (B, Cin, H, W), dtype=jnp.float32)
        # Matches torch: scale * torch.rand(..., dtype=cfloat) (uniform real & imag).
        scale = 1.0 / (Cin * Cout)
        ws = (Cin, Cout, modes1, modes2)
        w1 = (scale * (jax.random.uniform(kw1r, ws)
                       + 1j * jax.random.uniform(kw1i, ws))).astype(jnp.complex64)
        w2 = (scale * (jax.random.uniform(kw2r, ws)
                       + 1j * jax.random.uniform(kw2i, ws))).astype(jnp.complex64)

        out = spectral_conv2d_fast(x, w1, w2, modes1=modes1, modes2=modes2)
        out = jax.block_until_ready(out)
        ref = jax.block_until_ready(_ref_forward(x, w1, w2, modes1, modes2))
        assert out.shape == (B, Cout, H, W)
        err = float(jnp.max(jnp.abs(out - ref)))
        assert jnp.allclose(out, ref, atol=1e-4, rtol=1e-4), err

    k1, k2 = jax.random.split(jax.random.PRNGKey(0))
    # Primary toy case (grid collapses to one step; shapes the module implies).
    run_case(k1, B=2, Cin=4, Cout=4, H=16, W=16, modes1=6, modes2=6)
    # Slightly larger case that exercises the multi-step (mode-tiled) grid.
    run_case(k2, B=4, Cin=8, Cout=8, H=32, W=32, modes1=12, modes2=12)

    print("KERNEL_OK")
</pallas_src>

<mosaic_0001>
module attributes {stable_mosaic.version = 11 : i64} {
  func.func @_spectral_mul_kernel(%arg0: i32, %arg1: i32, %arg2: i32, %arg3: memref<2x4x2x128xf32, #tpu.memory_space<vmem>>, %arg4: memref<2x4x4x128xf32, #tpu.memory_space<vmem>>, %arg5: memref<2x2x4x128xf32, #tpu.memory_space<vmem>>) attributes {dimension_semantics = [#tpu.dimension_semantics<parallel>, #tpu.dimension_semantics<parallel>, #tpu.dimension_semantics<parallel>], iteration_bounds = array<i64: 1, 1, 1>, scalar_prefetch = 0 : i64, scratch_operands = 0 : i64, tpu.core_type = #tpu.core_type<tc>, window_params = [{transform_indices = @transform_0, window_bounds = array<i64: 2, 4, 2, 128>}, {transform_indices = @transform_1, window_bounds = array<i64: 2, 4, 4, 128>}, {transform_indices = @transform_2, window_bounds = array<i64: 2, 2, 4, 128>}]} {
    %cst = arith.constant 0.000000e+00 : f32
    %0 = vector.broadcast %cst : f32 to vector<2x4x128xf32>
    %c0_i32 = arith.constant 0 : i32
    %c0 = arith.constant 0 : index
    %1 = arith.index_cast %c0_i32 : i32 to index
    %c0_0 = arith.constant 0 : index
    %c0_1 = arith.constant 0 : index
    %2 = vector.load %arg3[%c0, %1, %c0_0, %c0_1] : memref<2x4x2x128xf32, #tpu.memory_space<vmem>>, vector<1x1x2x128xf32>
    %3 = vector.shape_cast %2 : vector<1x1x2x128xf32> to vector<2x128xf32>
    %c1 = arith.constant 1 : index
    %4 = arith.index_cast %c0_i32 : i32 to index
    %c0_2 = arith.constant 0 : index
    %c0_3 = arith.constant 0 : index
    %5 = vector.load %arg3[%c1, %4, %c0_2, %c0_3] : memref<2x4x2x128xf32, #tpu.memory_space<vmem>>, vector<1x1x2x128xf32>
    %6 = vector.shape_cast %5 : vector<1x1x2x128xf32> to vector<2x128xf32>
    %c0_4 = arith.constant 0 : index
    %7 = arith.index_cast %c0_i32 : i32 to index
    %c0_5 = arith.constant 0 : index
    %c0_6 = arith.constant 0 : index
    %8 = vector.load %arg4[%c0_4, %7, %c0_5, %c0_6] : memref<2x4x4x128xf32, #tpu.memory_space<vmem>>, vector<1x1x4x128xf32>
    %9 = vector.shape_cast %8 : vector<1x1x4x128xf32> to vector<4x128xf32>
    %c1_7 = arith.constant 1 : index
    %10 = arith.index_cast %c0_i32 : i32 to index
    %c0_8 = arith.constant 0 : index
    %c0_9 = arith.constant 0 : index
    %11 = vector.load %arg4[%c1_7, %10, %c0_8, %c0_9] : memref<2x4x4x128xf32, #tpu.memory_space<vmem>>, vector<1x1x4x128xf32>
    %12 = vector.shape_cast %11 : vector<1x1x4x128xf32> to vector<4x128xf32>
    %13 = vector.shape_cast %3 : vector<2x128xf32> to vector<2x1x128xf32>
    %14 = vector.shape_cast %6 : vector<2x128xf32> to vector<2x1x128xf32>
    %15 = vector.shape_cast %9 : vector<4x128xf32> to vector<1x4x128xf32>
    %16 = vector.shape_cast %12 : vector<4x128xf32> to vector<1x4x128xf32>
    %17 = vector.broadcast %13 : vector<2x1x128xf32> to vector<2x4x128xf32>
    %18 = vector.broadcast %15 : vector<1x4x128xf32> to vector<2x4x128xf32>
    %19 = arith.mulf %17, %18 : vector<2x4x128xf32>
    %20 = vector.broadcast %14 : vector<2x1x128xf32> to vector<2x4x128xf32>
    %21 = vector.broadcast %16 : vector<1x4x128xf32> to vector<2x4x128xf32>
    %22 = arith.mulf %20, %21 : vector<2x4x128xf32>
    %23 = arith.subf %19, %22 : vector<2x4x128xf32>
    %24 = arith.addf %0, %23 : vector<2x4x128xf32>
    %25 = vector.broadcast %13 : vector<2x1x128xf32> to vector<2x4x128xf32>
    %26 = vector.broadcast %16 : vector<1x4x128xf32> to vector<2x4x128xf32>
    %27 = arith.mulf %25, %26 : vector<2x4x128xf32>
    %28 = vector.broadcast %14 : vector<2x1x128xf32> to vector<2x4x128xf32>
    %29 = vector.broadcast %15 : vector<1x4x128xf32> to vector<2x4x128xf32>
    %30 = arith.mulf %28, %29 : vector<2x4x128xf32>
    %31 = arith.addf %27, %30 : vector<2x4x128xf32>
    %32 = arith.addf %0, %31 : vector<2x4x128xf32>
    %c1_i32 = arith.constant 1 : i32
    %c0_10 = arith.constant 0 : index
    %33 = arith.index_cast %c1_i32 : i32 to index
    %c0_11 = arith.constant 0 : index
    %c0_12 = arith.constant 0 : index
    %34 = vector.load %arg3[%c0_10, %33, %c0_11, %c0_12] : memref<2x4x2x128xf32, #tpu.memory_space<vmem>>, vector<1x1x2x128xf32>
    %35 = vector.shape_cast %34 : vector<1x1x2x128xf32> to vector<2x128xf32>
    %c1_13 = arith.constant 1 : index
    %36 = arith.index_cast %c1_i32 : i32 to index
    %c0_14 = arith.constant 0 : index
    %c0_15 = arith.constant 0 : index
    %37 = vector.load %arg3[%c1_13, %36, %c0_14, %c0_15] : memref<2x4x2x128xf32, #tpu.memory_space<vmem>>, vector<1x1x2x128xf32>
    %38 = vector.shape_cast %37 : vector<1x1x2x128xf32> to vector<2x128xf32>
    %c0_16 = arith.constant 0 : index
    %39 = arith.index_cast %c1_i32 : i32 to index
    %c0_17 = arith.constant 0 : index
    %c0_18 = arith.constant 0 : index
    %40 = vector.load %arg4[%c0_16, %39, %c0_17, %c0_18] : memref<2x4x4x128xf32, #tpu.memory_space<vmem>>, vector<1x1x4x128xf32>
    %41 = vector.shape_cast %40 : vector<1x1x4x128xf32> to vector<4x128xf32>
    %c1_19 = arith.constant 1 : index
    %42 = arith.index_cast %c1_i32 : i32 to index
    %c0_20 = arith.constant 0 : index
    %c0_21 = arith.constant 0 : index
    %43 = vector.load %arg4[%c1_19, %42, %c0_20, %c0_21] : memref<2x4x4x128xf32, #tpu.memory_space<vmem>>, vector<1x1x4x128xf32>
    %44 = vector.shape_cast %43 : vector<1x1x4x128xf32> to vector<4x128xf32>
    %45 = vector.shape_cast %35 : vector<2x128xf32> to vector<2x1x128xf32>
    %46 = vector.shape_cast %38 : vector<2x128xf32> to vector<2x1x128xf32>
    %47 = vector.shape_cast %41 : vector<4x128xf32> to vector<1x4x128xf32>
    %48 = vector.shape_cast %44 : vector<4x128xf32> to vector<1x4x128xf32>
    %49 = vector.broadcast %45 : vector<2x1x128xf32> to vector<2x4x128xf32>
    %50 = vector.broadcast %47 : vector<1x4x128xf32> to vector<2x4x128xf32>
    %51 = arith.mulf %49, %50 : vector<2x4x128xf32>
    %52 = vector.broadcast %46 : vector<2x1x128xf32> to vector<2x4x128xf32>
    %53 = vector.broadcast %48 : vector<1x4x128xf32> to vector<2x4x128xf32>
    %54 = arith.mulf %52, %53 : vector<2x4x128xf32>
    %55 = arith.subf %51, %54 : vector<2x4x128xf32>
    %56 = arith.addf %24, %55 : vector<2x4x128xf32>
    %57 = vector.broadcast %45 : vector<2x1x128xf32> to vector<2x4x128xf32>
    %58 = vector.broadcast %48 : vector<1x4x128xf32> to vector<2x4x128xf32>
    %59 = arith.mulf %57, %58 : vector<2x4x128xf32>
    %60 = vector.broadcast %46 : vector<2x1x128xf32> to vector<2x4x128xf32>
    %61 = vector.broadcast %47 : vector<1x4x128xf32> to vector<2x4x128xf32>
    %62 = arith.mulf %60, %61 : vector<2x4x128xf32>
    %63 = arith.addf %59, %62 : vector<2x4x128xf32>
    %64 = arith.addf %32, %63 : vector<2x4x128xf32>
    %c2_i32 = arith.constant 2 : i32
    %c0_22 = arith.constant 0 : index
    %65 = arith.index_cast %c2_i32 : i32 to index
    %c0_23 = arith.constant 0 : index
    %c0_24 = arith.constant 0 : index
    %66 = vector.load %arg3[%c0_22, %65, %c0_23, %c0_24] : memref<2x4x2x128xf32, #tpu.memory_space<vmem>>, vector<1x1x2x128xf32>
    %67 = vector.shape_cast %66 : vector<1x1x2x128xf32> to vector<2x128xf32>
    %c1_25 = arith.constant 1 : index
    %68 = arith.index_cast %c2_i32 : i32 to index
    %c0_26 = arith.constant 0 : index
    %c0_27 = arith.constant 0 : index
    %69 = vector.load %arg3[%c1_25, %68, %c0_26, %c0_27] : memref<2x4x2x128xf32, #tpu.memory_space<vmem>>, vector<1x1x2x128xf32>
    %70 = vector.shape_cast %69 : vector<1x1x2x128xf32> to vector<2x128xf32>
    %c0_28 = arith.constant 0 : index
    %71 = arith.index_cast %c2_i32 : i32 to index
    %c0_29 = arith.constant 0 : index
    %c0_30 = arith.constant 0 : index
    %72 = vector.load %arg4[%c0_28, %71, %c0_29, %c0_30] : memref<2x4x4x128xf32, #tpu.memory_space<vmem>>, vector<1x1x4x128xf32>
    %73 = vector.shape_cast %72 : vector<1x1x4x128xf32> to vector<4x128xf32>
    %c1_31 = arith.constant 1 : index
    %74 = arith.index_cast %c2_i32 : i32 to index
    %c0_32 = arith.constant 0 : index
    %c0_33 = arith.constant 0 : index
    %75 = vector.load %arg4[%c1_31, %74, %c0_32, %c0_33] : memref<2x4x4x128xf32, #tpu.memory_space<vmem>>, vector<1x1x4x128xf32>
    %76 = vector.shape_cast %75 : vector<1x1x4x128xf32> to vector<4x128xf32>
    %77 = vector.shape_cast %67 : vector<2x128xf32> to vector<2x1x128xf32>
    %78 = vector.shape_cast %70 : vector<2x128xf32> to vector<2x1x128xf32>
    %79 = vector.shape_cast %73 : vector<4x128xf32> to vector<1x4x128xf32>
    %80 = vector.shape_cast %76 : vector<4x128xf32> to vector<1x4x128xf32>
    %81 = vector.broadcast %77 : vector<2x1x128xf32> to vector<2x4x128xf32>
    %82 = vector.broadcast %79 : vector<1x4x128xf32> to vector<2x4x128xf32>
    %83 = arith.mulf %81, %82 : vector<2x4x128xf32>
    %84 = vector.broadcast %78 : vector<2x1x128xf32> to vector<2x4x128xf32>
    %85 = vector.broadcast %80 : vector<1x4x128xf32> to vector<2x4x128xf32>
    %86 = arith.mulf %84, %85 : vector<2x4x128xf32>
    %87 = arith.subf %83, %86 : vector<2x4x128xf32>
    %88 = arith.addf %56, %87 : vector<2x4x128xf32>
    %89 = vector.broadcast %77 : vector<2x1x128xf32> to vector<2x4x128xf32>
    %90 = vector.broadcast %80 : vector<1x4x128xf32> to vector<2x4x128xf32>
    %91 = arith.mulf %89, %90 : vector<2x4x128xf32>
    %92 = vector.broadcast %78 : vector<2x1x128xf32> to vector<2x4x128xf32>
    %93 = vector.broadcast %79 : vector<1x4x128xf32> to vector<2x4x128xf32>
    %94 = arith.mulf %92, %93 : vector<2x4x128xf32>
    %95 = arith.addf %91, %94 : vector<2x4x128xf32>
    %96 = arith.addf %64, %95 : vector<2x4x128xf32>
    %c3_i32 = arith.constant 3 : i32
    %c0_34 = arith.constant 0 : index
    %97 = arith.index_cast %c3_i32 : i32 to index
    %c0_35 = arith.constant 0 : index
    %c0_36 = arith.constant 0 : index
    %98 = vector.load %arg3[%c0_34, %97, %c0_35, %c0_36] : memref<2x4x2x128xf32, #tpu.memory_space<vmem>>, vector<1x1x2x128xf32>
    %99 = vector.shape_cast %98 : vector<1x1x2x128xf32> to vector<2x128xf32>
    %c1_37 = arith.constant 1 : index
    %100 = arith.index_cast %c3_i32 : i32 to index
    %c0_38 = arith.constant 0 : index
    %c0_39 = arith.constant 0 : index
    %101 = vector.load %arg3[%c1_37, %100, %c0_38, %c0_39] : memref<2x4x2x128xf32, #tpu.memory_space<vmem>>, vector<1x1x2x128xf32>
    %102 = vector.shape_cast %101 : vector<1x1x2x128xf32> to vector<2x128xf32>
    %c0_40 = arith.constant 0 : index
    %103 = arith.index_cast %c3_i32 : i32 to index
    %c0_41 = arith.constant 0 : index
    %c0_42 = arith.constant 0 : index
    %104 = vector.load %arg4[%c0_40, %103, %c0_41, %c0_42] : memref<2x4x4x128xf32, #tpu.memory_space<vmem>>, vector<1x1x4x128xf32>
    %105 = vector.shape_cast %104 : vector<1x1x4x128xf32> to vector<4x128xf32>
    %c1_43 = arith.constant 1 : index
    %106 = arith.index_cast %c3_i32 : i32 to index
    %c0_44 = arith.constant 0 : index
    %c0_45 = arith.constant 0 : index
    %107 = vector.load %arg4[%c1_43, %106, %c0_44, %c0_45] : memref<2x4x4x128xf32, #tpu.memory_space<vmem>>, vector<1x1x4x128xf32>
    %108 = vector.shape_cast %107 : vector<1x1x4x128xf32> to vector<4x128xf32>
    %109 = vector.shape_cast %99 : vector<2x128xf32> to vector<2x1x128xf32>
    %110 = vector.shape_cast %102 : vector<2x128xf32> to vector<2x1x128xf32>
    %111 = vector.shape_cast %105 : vector<4x128xf32> to vector<1x4x128xf32>
    %112 = vector.shape_cast %108 : vector<4x128xf32> to vector<1x4x128xf32>
    %113 = vector.broadcast %109 : vector<2x1x128xf32> to vector<2x4x128xf32>
    %114 = vector.broadcast %111 : vector<1x4x128xf32> to vector<2x4x128xf32>
    %115 = arith.mulf %113, %114 : vector<2x4x128xf32>
    %116 = vector.broadcast %110 : vector<2x1x128xf32> to vector<2x4x128xf32>
    %117 = vector.broadcast %112 : vector<1x4x128xf32> to vector<2x4x128xf32>
    %118 = arith.mulf %116, %117 : vector<2x4x128xf32>
    %119 = arith.subf %115, %118 : vector<2x4x128xf32>
    %120 = arith.addf %88, %119 : vector<2x4x128xf32>
    %121 = vector.broadcast %109 : vector<2x1x128xf32> to vector<2x4x128xf32>
    %122 = vector.broadcast %112 : vector<1x4x128xf32> to vector<2x4x128xf32>
    %123 = arith.mulf %121, %122 : vector<2x4x128xf32>
    %124 = vector.broadcast %110 : vector<2x1x128xf32> to vector<2x4x128xf32>
    %125 = vector.broadcast %111 : vector<1x4x128xf32> to vector<2x4x128xf32>
    %126 = arith.mulf %124, %125 : vector<2x4x128xf32>
    %127 = arith.addf %123, %126 : vector<2x4x128xf32>
    %128 = arith.addf %96, %127 : vector<2x4x128xf32>
    %c4_i32 = arith.constant 4 : i32
    %c0_46 = arith.constant 0 : index
    %c0_47 = arith.constant 0 : index
    %c0_48 = arith.constant 0 : index
    %c0_49 = arith.constant 0 : index
    %129 = vector.load %arg5[%c0_46, %c0_47, %c0_48, %c0_49] : memref<2x2x4x128xf32, #tpu.memory_space<vmem>>, vector<1x2x4x128xf32>
    %130 = vector.shape_cast %129 : vector<1x2x4x128xf32> to vector<2x4x128xf32>
    %131 = vector.shape_cast %120 : vector<2x4x128xf32> to vector<1x2x4x128xf32>
    tpu.vector_store %arg5[%c0_46, %c0_47, %c0_48, %c0_49], %131 {strides = array<i32>} : memref<2x2x4x128xf32, #tpu.memory_space<vmem>>, vector<1x2x4x128xf32>,
    %c1_50 = arith.constant 1 : index
    %c0_51 = arith.constant 0 : index
    %c0_52 = arith.constant 0 : index
    %c0_53 = arith.constant 0 : index
    %132 = vector.load %arg5[%c1_50, %c0_51, %c0_52, %c0_53] : memref<2x2x4x128xf32, #tpu.memory_space<vmem>>, vector<1x2x4x128xf32>
    %133 = vector.shape_cast %132 : vector<1x2x4x128xf32> to vector<2x4x128xf32>
    %134 = vector.shape_cast %128 : vector<2x4x128xf32> to vector<1x2x4x128xf32>
    tpu.vector_store %arg5[%c1_50, %c0_51, %c0_52, %c0_53], %134 {strides = array<i32>} : memref<2x2x4x128xf32, #tpu.memory_space<vmem>>, vector<1x2x4x128xf32>,
    return
  }
  func.func @transform_0(%arg0: i32, %arg1: i32, %arg2: i32) -> (i32, i32, i32, i32) {
    %c0_i32 = arith.constant 0 : i32
    %c0_i32_0 = arith.constant 0 : i32
    %c0_i32_1 = arith.constant 0 : i32
    return %c0_i32, %c0_i32_0, %arg2, %arg0 : i32, i32, i32, i32
  }
  func.func @transform_1(%arg0: i32, %arg1: i32, %arg2: i32) -> (i32, i32, i32, i32) {
    %c0_i32 = arith.constant 0 : i32
    %c0_i32_0 = arith.constant 0 : i32
    %c0_i32_1 = arith.constant 0 : i32
    return %c0_i32, %c0_i32_0, %arg1, %arg0 : i32, i32, i32, i32
  }
  func.func @transform_2(%arg0: i32, %arg1: i32, %arg2: i32) -> (i32, i32, i32, i32) {
    %c0_i32 = arith.constant 0 : i32
    %c0_i32_0 = arith.constant 0 : i32
    return %c0_i32, %arg2, %arg1, %arg0 : i32, i32, i32, i32
  }
}

</mosaic_0001>

<bundles_post_ra>
// kernel: custom-call
= control target key start
LH: loop header
LB: loop body
LE: loop exit
PB: predicated region body
PF: predicated region fallthrough
CT: control target
= control target key end

     0   :  { %2 = vsyncpa [#allocation0], 0  ;;  %s47_s0 = inlined_call_operand.hbm [shape: c64[4,4,6,6], index: 0, kind: input, shape index: {}]   ;;  %s48_s1 = inlined_call_operand.vmem [shape: f32[4,4,6,6], index: 1, kind: output, shape index: {}]  }
   0x1   :  { %s3_s8 = sshll.u32 %s48_s1, 4  ;;  %s4_s8 = int_to_ptr.vmem [resolvable:$true] %s3_s8 }
   0x2   :  { %s17_s9 = scalar_lea.vmem %s4_s8, 1536  ;;  %p22_p1 = scmp.lt.s32.totalorder %s4_s8, %s4_s8 }
   0x3   :  { %p18_p0 = scmp.ne.s32.totalorder %s4_s8, %s17_s9  ;;  %p23_p2 = scmp.lt.s32.totalorder %s17_s9, %s17_s9 }
   0x5   :  { %p24_p3 = por %p23_p2, %p22_p1 }
   0x7   :  { %p25_p4 = pnand %p24_p3, %p18_p0 }
   0x9   :  { %28 = shalt.err (!%p25_p4)  }
   0xa   :  { %6 = dma.hbm_to_vmem [thread:$0]  %s47_s0, 1536, %s4_s8, [#allocation0] }
   0xb   :  { %29 = dma.done.wait [#allocation0], 1536  }
   0xc   :  { %30 = vsyncadd [#allocation0], 4294965760 }
   0xd   :  { %8 = vsyncpa [#allocation0], 1 }

// kernel: custom-call.1
= control target key start
LH: loop header
LB: loop body
LE: loop exit
PB: predicated region body
PF: predicated region fallthrough
CT: control target
= control target key end

     0   :  { %s51_s0 = inlined_call_operand.hbm [shape: c64[4,4,6,6], index: 0, kind: input, shape index: {}]   ;;  %s52_s1 = inlined_call_operand.vmem [shape: f32[4,4,6,6], index: 1, kind: output, shape index: {}]  }
   0x1   :  { %s2_s8 = scalar_lea.hbm %s51_s0, 1536 }
   0x2   :  { %3 = vsyncpa [#allocation0], 0  ;;  %s4_s11 = sshll.u32 %s52_s1, 4  ;;  %s5_s11 = int_to_ptr.vmem [resolvable:$true] %s4_s11 }
   0x3   :  { %s20_s12 = scalar_lea.vmem %s5_s11, 1536  ;;  %p25_p1 = scmp.lt.s32.totalorder %s5_s11, %s5_s11 }
   0x4   :  { %p21_p0 = scmp.ne.s32.totalorder %s5_s11, %s20_s12  ;;  %p26_p2 = scmp.lt.s32.totalorder %s20_s12, %s20_s12 }
   0x6   :  { %p27_p3 = por %p26_p2, %p25_p1 }
   0x8   :  { %p28_p4 = pnand %p27_p3, %p21_p0 }
   0xa   :  { %31 = shalt.err (!%p28_p4)  }
   0xb   :  { %7 = dma.hbm_to_vmem [thread:$0]  %s2_s8, 1536, %s5_s11, [#allocation0] }
   0xc   :  { %33 = dma.done.wait [#allocation0], 1536  }
   0xd   :  { %34 = vsyncadd [#allocation0], 4294965760 }
   0xe   :  { %9 = vsyncpa [#allocation0], 1 }

// kernel: reverse.0
= control target key start
LH: loop header
LB: loop body
LE: loop exit
PB: predicated region body
PF: predicated region fallthrough
CT: control target
= control target key end

     0   :  { %v72_v3 = vlaneseq  ;;  %v65_v9 = vld [vmem:[#allocation0 + $0x7] ss:$-1 sm:$0xff]  ;;  %v79_v12 = vld [vmem:[#allocation0 + $0x17] ss:$-1 sm:$0xff]  ;;  %s331_s0 = inlined_call_operand.vmem [shape: f32[2,4,16,7], index: 0, kind: input, shape index: {}]   ;;  %s332_s1 = inlined_call_operand.vmem [shape: f32[2,4,16,7], index: 1, kind: output, shape index: {}]  }
   0x1   :  { %v45_v0 = vld [vmem:[%s331_s0] sm:$0xff]  ;;  %v47_v1 = vld [vmem:[%s331_s0 + $0x8] sm:$0xff]  ;;  %v49_v2 = vld [vmem:[%s331_s0 + $0x10] sm:$0xff]  ;;  %v66_v10 = vrot.slane %v65_v9, 1  ;;  %v80_v14 = vrot.slane %v79_v12, 1 }
   0x2   :  { %46 = vst [vmem:[#allocation0 + $0x8] sm:$0xff] %v45_v0  ;;  %48 = vst [vmem:[#allocation0 + $0x18] sm:$0xff] %v47_v1  ;;  %v51_v4 = vld [vmem:[%s331_s0 + $0x18] sm:$0xff]  ;;  %v53_v5 = vld [vmem:[%s331_s0 + $0x20] sm:$0xff]  ;;  %v73_v11 = vshrl.u32 %v72_v3, 7 }
   0x3   :  { %50 = vst [vmem:[#allocation0 + $0x28] sm:$0xff] %v49_v2  ;;  %v55_v6 = vld [vmem:[%s331_s0 + $0x28] sm:$0xff]  ;;  %52 = vst [vmem:[#allocation0 + $0x38] sm:$0xff] %v51_v4  ;;  %v57_v7 = vld [vmem:[%s331_s0 + $0x30] sm:$0xff] }
   0x4   :  { %54 = vst [vmem:[#allocation0 + $0x48] sm:$0xff] %v53_v5  ;;  %56 = vst [vmem:[#allocation0 + $0x58] sm:$0xff] %v55_v6  ;;  %v59_v8 = vld [vmem:[%s331_s0 + $0x38] sm:$0xff]  ;;  %v93_v13 = vld [vmem:[#allocation0 + $0x27] ss:$-1 sm:$0xff]  ;;  %vm74_vm0 = vcmp.lt.s32.totalorder %v73_v11, 7 }
   0x5   :  { %58 = vst [vmem:[#allocation0 + $0x68] sm:$0xff] %v57_v7  ;;  %60 = vst [vmem:[#allocation0 + $0x78] sm:$0xff] %v59_v8  ;;  %v94_v15 = vrot.slane %v93_v13, 1  ;;  %v107_v16 = vld [vmem:[#allocation0 + $0x37] ss:$-1 sm:$0xff] }
   0x6   :  { %67 = vst [vmem:[#allocation1] sm:$0xff] %v66_v10  ;;  %v108_v17 = vrot.slane %v107_v16, 1  ;;  %v121_v18 = vld [vmem:[#allocation0 + $0x47] ss:$-1 sm:$0xff]  ;;  %v135_v19 = vld [vmem:[#allocation0 + $0x57] ss:$-1 sm:$0xff] }
   0x7   :  { %81 = vst [vmem:[#allocation1 + $0x8] sm:$0xff] %v80_v14  ;;  %95 = vst [vmem:[#allocation1 + $0x10] sm:$0xff] %v94_v15  ;;  %v122_v20 = vrot.slane %v121_v18, 1  ;;  %v136_v21 = vrot.slane %v135_v19, 1  ;;  %v149_v22 = vld [vmem:[#allocation0 + $0x67] ss:$-1 sm:$0xff] }
   0x8   :  { %v163_v23 = vld [vmem:[#allocation0 + $0x77] ss:$-1 sm:$0xff]  ;;  %109 = vst [vmem:[#allocation1 + $0x18] sm:$0xff] %v108_v17  ;;  %v150_v24 = vrot.slane %v149_v22, 1 }
   0x9   :  { %v164_v25 = vrot.slane %v163_v23, 1  ;;  %v70_v26 = vld [vmem:[#allocation0 + $0xf] ss:$-1 sm:$0xff]  ;;  %v84_v27 = vld [vmem:[#allocation0 + $0x1f] ss:$-1 sm:$0xff]  ;;  %123 = vst [vmem:[#allocation1 + $0x20] sm:$0xff] %v122_v20 }
   0xa   :  { %v98_v28 = vld [vmem:[#allocation0 + $0x2f] ss:$-1 sm:$0xff]  ;;  %137 = vst [vmem:[#allocation1 + $0x28] sm:$0xff] %v136_v21  ;;  %v71_v29 = vrot.slane %v70_v26, 1  ;;  %v85_v30 = vrot.slane %v84_v27, 1  ;;  %151 = vst [vmem:[#allocation1 + $0x30] sm:$0xff] %v150_v24 }
   0xb   :  { %v99_v31 = vrot.slane %v98_v28, 1  ;;  %v112_v32 = vld [vmem:[#allocation0 + $0x3f] ss:$-1 sm:$0xff]  ;;  %165 = vst [vmem:[#allocation1 + $0x38] sm:$0xff] %v164_v25  ;;  %v126_v34 = vld [vmem:[#allocation0 + $0x4f] ss:$-1 sm:$0xff] }
   0xc   :  { %v113_v33 = vrot.slane %v112_v32, 1  ;;  %v140_v35 = vld [vmem:[#allocation0 + $0x5f] ss:$-1 sm:$0xff]  ;;  %75 = vst.msk [vmem:[#allocation1] sm:$0xff] %vm74_vm0, %v71_v29  ;;  %89 = vst.msk [vmem:[#allocation1 + $0x8] sm:$0xff] %vm74_vm0, %v85_v30  ;;  %v127_v36 = vrot.slane %v126_v34, 1 }
   0xd   :  { %103 = vst.msk [vmem:[#allocation1 + $0x10] sm:$0xff] %vm74_vm0, %v99_v31  ;;  %v141_v37 = vrot.slane %v140_v35, 1  ;;  %v154_v38 = vld [vmem:[#allocation0 + $0x6f] ss:$-1 sm:$0xff]  ;;  %v168_v39 = vld [vmem:[#allocation0 + $0x7f] ss:$-1 sm:$0xff] }
   0xe   :  { %117 = vst.msk [vmem:[#allocation1 + $0x18] sm:$0xff] %vm74_vm0, %v113_v33  ;;  %v155_v40 = vrot.slane %v154_v38, 1  ;;  %v169_v41 = vrot.slane %v168_v39, 1  ;;  %131 = vst.msk [vmem:[#allocation1 + $0x20] sm:$0xff] %vm74_vm0, %v127_v36 }
   0xf   :  { %145 = vst.msk [vmem:[#allocation1 + $0x28] sm:$0xff] %vm74_vm0, %v141_v37 }
  0x10   :  { %159 = vst.msk [vmem:[#allocation1 + $0x30] sm:$0xff] %vm74_vm0, %v155_v40  ;;  %173 = vst.msk [vmem:[#allocation1 + $0x38] sm:$0xff] %vm74_vm0, %v169_v41 }
  0x13   :  { %v216_v42 = vld [vmem:[#allocation1] sm:$0xff]  ;;  %v218_v43 = vld [vmem:[#allocation1 + $0x8] sm:$0xff] }
  0x14   :  { %v220_v44 = vld [vmem:[#allocation1 + $0x10] sm:$0xff]  ;;  %217 = vst [vmem:[%s332_s1] sm:$0xff] %v216_v42  ;;  %219 = vst [vmem:[%s332_s1 + $0x8] sm:$0xff] %v218_v43 }
  0x15   :  { %221 = vst [vmem:[%s332_s1 + $0x10] sm:$0xff] %v220_v44  ;;  %v222_v45 = vld [vmem:[#allocation1 + $0x18] sm:$0xff]  ;;  %v224_v46 = vld [vmem:[#allocation1 + $0x20] sm:$0xff] }
  0x16   :  { %223 = vst [vmem:[%s332_s1 + $0x18] sm:$0xff] %v222_v45  ;;  %v226_v47 = vld [vmem:[#allocation1 + $0x28] sm:$0xff]  ;;  %225 = vst [vmem:[%s332_s1 + $0x20] sm:$0xff] %v224_v46 }
  0x17   :  { %227 = vst [vmem:[%s332_s1 + $0x28] sm:$0xff] %v226_v47  ;;  %v228_v48 = vld [vmem:[#allocation1 + $0x30] sm:$0xff]  ;;  %v230_v49 = vld [vmem:[#allocation1 + $0x38] sm:$0xff] }
  0x18   :  { %229 = vst [vmem:[%s332_s1 + $0x30] sm:$0xff] %v228_v48  ;;  %231 = vst [vmem:[%s332_s1 + $0x38] sm:$0xff] %v230_v49 }

// kernel: spectral_conv2d_fast.1
= control target key start
LH: loop header
LB: loop body
LE: loop exit
PB: predicated region body
PF: predicated region fallthrough
CT: control target
= control target key end

     0   :  { %v29_v0 = vlaneseq  ;;  %v403_v2 = vmov 1966171168   ;;  %s563_s0 = inlined_call_operand.vmem [shape: f32[2,4,2,128], index: 0, kind: input, shape index: {}]   ;;  %s564_s1 = inlined_call_operand.vmem [shape: f32[2,4,4,128], index: 1, kind: input, shape index: {}]   ;;  %s565_s2 = inlined_call_operand.vmem [shape: f32[2,2,4,128], index: 2, kind: output, shape index: {}]  }
   0x1   :  { %v380_v1 = vld.sshfl [vmem:[%s563_s0] sm:$0x11 pattern:$0x75316420]  ;;  %v27_v3 = vunpack.c.l.s4 %v403_v2  ;;  %v443_v14 = vld [vmem:[%s564_s1 + $0x10] sm:$0xf] }
   0x2   :  { %v381_v4 = vld.sshfl [vmem:[%s563_s0 + $0x8] sm:$0x11 pattern:$0x75316420]  ;;  %v30_v6 = vshrl.u32 %v29_v0, 7  ;;  %v25_v9 = vcombine.high %v380_v1, %v380_v1 }
   0x3   :  { %v28_v5 = vunpack.c.0.s8 %v27_v3  ;;  %v386_v7 = vld.sshfl [vmem:[%s563_s0 + $0x2] sm:$0x11 pattern:$0x75316420]  ;;  %v48_v10 = vcombine.high %v381_v4, %v381_v4  ;;  %v448_v15 = vld [vmem:[%s564_s1 + $0x4] sm:$0xf] }
   0x4   :  { %v387_v8 = vld.sshfl [vmem:[%s563_s0 + $0xa] sm:$0x11 pattern:$0x75316420]  ;;  %v433_v12 = vsub.s32 0, %v30_v6  ;;  %v115_v17 = vcombine.high %v386_v7, %v386_v7 }
   0x5   :  { %v431_v11 = vsub.s32 %v28_v5, %v30_v6  ;;  %v438_v13 = vld [vmem:[%s564_s1] sm:$0xf]  ;;  %v392_v16 = vld.sshfl [vmem:[%s563_s0 + $0x4] sm:$0x11 pattern:$0x75316420]  ;;  %v138_v18 = vcombine.high %v387_v8, %v387_v8 }
   0x6   :  { %v458_v21 = vld [vmem:[%s564_s1 + $0x14] sm:$0xf]  ;;  %v393_v24 = vld.sshfl [vmem:[%s563_s0 + $0xc] sm:$0x11 pattern:$0x75316420] }
   0x7   :  { %v32_v19 = vrot.slane %v380_v1, %v431_v11  ;;  %v55_v20 = vrot.slane %v381_v4, %v431_v11  ;;  %v122_v22 = vrot.slane %v386_v7, %v431_v11  ;;  %v145_v23 = vrot.slane %v387_v8, %v431_v11  ;;  %v468_v25 = vld [vmem:[%s564_s1 + $0x8] sm:$0xf]  ;;  %v398_v28 = vld.sshfl [vmem:[%s563_s0 + $0x6] sm:$0x11 pattern:$0x75316420] }
   0x8   :  { %v212_v26 = vrot.slane %v392_v16, %v431_v11  ;;  %v235_v27 = vrot.slane %v393_v24, %v431_v11  ;;  %v39_v29 = vrot.slane %v25_v9, %v431_v11  ;;  %v62_v30 = vrot.slane %v48_v10, %v431_v11  ;;  %v484_v35 = vld [vmem:[%s564_s1 + $0x18] sm:$0xf]  ;;  %v399_v36 = vld.sshfl [vmem:[%s563_s0 + $0xe] sm:$0x11 pattern:$0x75316420] }
   0x9   :  { %v66_v31 = vrot.slane %v32_v19, %v433_v12  ;;  %v78_v32 = vrot.slane %v55_v20, %v433_v12  ;;  %v156_v33 = vrot.slane %v122_v22, %v433_v12  ;;  %v168_v34 = vrot.slane %v145_v23, %v433_v12  ;;  %v500_v45 = vld [vmem:[%s564_s1 + $0xc] sm:$0xf]  ;;  %v505_v46 = vld [vmem:[%s564_s1 + $0x1c] sm:$0xf] }
   0xa   :  { %v246_v37 = vrot.slane %v212_v26, %v433_v12  ;;  %v258_v38 = vrot.slane %v235_v27, %v433_v12  ;;  %v302_v39 = vrot.slane %v398_v28, %v431_v11  ;;  %v325_v40 = vrot.slane %v399_v36, %v431_v11 }
   0xb   :  { %v73_v41 = vmul.f32 %v66_v31, %v438_v13  ;;  %v85_v42 = vmul.f32 %v443_v14, %v78_v32  ;;  %v163_v43 = vmul.f32 %v448_v15, %v156_v33  ;;  %v175_v44 = vmul.f32 %v458_v21, %v168_v34 }
   0xc   :  { %v253_v47 = vmul.f32 %v468_v25, %v246_v37  ;;  %v265_v48 = vmul.f32 %v484_v35, %v258_v38  ;;  %v336_v49 = vrot.slane %v302_v39, %v433_v12  ;;  %v348_v50 = vrot.slane %v325_v40, %v433_v12 }
   0xd   :  { %v87_v51 = vsub.f32 %v73_v41, %v85_v42  ;;  %v177_v52 = vsub.f32 %v163_v43, %v175_v44  ;;  %v70_v53 = vrot.slane %v39_v29, %v433_v12  ;;  %v82_v54 = vrot.slane %v62_v30, %v433_v12 }
   0xe   :  { %v267_v55 = vsub.f32 %v253_v47, %v265_v48  ;;  %v343_v56 = vmul.f32 %v500_v45, %v336_v49  ;;  %v355_v57 = vmul.f32 %v505_v46, %v348_v50  ;;  %v129_v58 = vrot.slane %v115_v17, %v431_v11 }
   0xf   :  { %v179_v59 = vadd.f32 %v177_v52, %v87_v51  ;;  %v74_v60 = vmul.f32 %v70_v53, %v438_v13  ;;  %v86_v61 = vmul.f32 %v443_v14, %v82_v54  ;;  %v152_v62 = vrot.slane %v138_v18, %v431_v11 }
  0x10   :  { %v357_v63 = vsub.f32 %v343_v56, %v355_v57  ;;  %v160_v0 = vrot.slane %v129_v58, %v433_v12  ;;  %v205_v1 = vcombine.high %v392_v16, %v392_v16  ;;  %v228_v2 = vcombine.high %v393_v24, %v393_v24 }
  0x11   :  { %v269_v3 = vadd.f32 %v267_v55, %v179_v59  ;;  %v88_v4 = vsub.f32 %v74_v60, %v86_v61  ;;  %v172_v5 = vrot.slane %v152_v62, %v433_v12  ;;  %v295_v6 = vcombine.high %v398_v28, %v398_v28 }
  0x12   :  { %v164_v7 = vmul.f32 %v448_v15, %v160_v0  ;;  %v219_v8 = vrot.slane %v205_v1, %v431_v11  ;;  %v242_v9 = vrot.slane %v228_v2, %v431_v11  ;;  %v318_v10 = vcombine.high %v399_v36, %v399_v36 }
  0x13   :  { %v359_v17 = vadd.f32 %v357_v63, %v269_v3  ;;  %v176_v18 = vmul.f32 %v458_v21, %v172_v5  ;;  %v309_v19 = vrot.slane %v295_v6, %v431_v11  ;;  %v91_v16 = vmul.f32 %v443_v14, %v66_v31 }
  0x14   :  { %v250_v20 = vrot.slane %v219_v8, %v433_v12  ;;  %v262_v22 = vrot.slane %v242_v9, %v433_v12  ;;  %v332_v23 = vrot.slane %v318_v10, %v431_v11  ;;  %v93_v24 = vmul.f32 %v78_v32, %v438_v13 }
  0x15   :  { %369 = vst [vmem:[%s565_s2] sm:$0xf] %v359_v17  ;;  %v178_v26 = vsub.f32 %v164_v7, %v176_v18  ;;  %v340_v27 = vrot.slane %v309_v19, %v433_v12  ;;  %v181_v28 = vmul.f32 %v458_v21, %v156_v33  ;;  %v183_v29 = vmul.f32 %v448_v15, %v168_v34 }
  0x16   :  { %v254_v30 = vmul.f32 %v468_v25, %v250_v20  ;;  %v266_v31 = vmul.f32 %v484_v35, %v262_v22  ;;  %v352_v36 = vrot.slane %v332_v23, %v433_v12  ;;  %v95_v11 = vadd.f32 %v93_v24, %v91_v16 }
  0x17   :  { %v180_v39 = vadd.f32 %v178_v26, %v88_v4  ;;  %v344_v32 = vmul.f32 %v500_v45, %v340_v27  ;;  %v185_v40 = vadd.f32 %v183_v29, %v181_v28  ;;  %v271_v41 = vmul.f32 %v484_v35, %v246_v37 }
  0x18   :  { %v268_v42 = vsub.f32 %v254_v30, %v266_v31  ;;  %v356_v43 = vmul.f32 %v505_v46, %v352_v36  ;;  %v273_v33 = vmul.f32 %v468_v25, %v258_v38  ;;  %v361_v34 = vmul.f32 %v505_v46, %v336_v49 }
  0x19   :  { %v187_v44 = vadd.f32 %v185_v40, %v95_v11  ;;  %v363_v47 = vmul.f32 %v500_v45, %v348_v50  ;;  %v92_v48 = vmul.f32 %v443_v14, %v70_v53  ;;  %v94_v12 = vmul.f32 %v82_v54, %v438_v13 }
  0x1a   :  { %v270_v51 = vadd.f32 %v268_v42, %v180_v39  ;;  %v358_v52 = vsub.f32 %v344_v32, %v356_v43  ;;  %v275_v55 = vadd.f32 %v273_v33, %v271_v41  ;;  %v182_v56 = vmul.f32 %v458_v21, %v160_v0 }
  0x1b   :  { %v365_v37 = vadd.f32 %v363_v47, %v361_v34  ;;  %v96_v57 = vadd.f32 %v94_v12, %v92_v48  ;;  %v184_v58 = vmul.f32 %v448_v15, %v172_v5  ;;  %v272_v38 = vmul.f32 %v484_v35, %v250_v20 }
  0x1c   :  { %v360_v59 = vadd.f32 %v358_v52, %v270_v51  ;;  %v277_v49 = vadd.f32 %v275_v55, %v187_v44  ;;  %v274_v60 = vmul.f32 %v468_v25, %v262_v22  ;;  %v362_v50 = vmul.f32 %v505_v46, %v340_v27 }
  0x1d   :  { %v186_v14 = vadd.f32 %v184_v58, %v182_v56  ;;  %v364_v13 = vmul.f32 %v500_v45, %v352_v36 }
  0x1e   :  { %370 = vst [vmem:[%s565_s2 + $0x4] sm:$0xf] %v360_v59  ;;  %v367_v21 = vadd.f32 %v365_v37, %v277_v49  ;;  %v276_v53 = vadd.f32 %v274_v60, %v272_v38 }
  0x1f   :  { %v188_v54 = vadd.f32 %v186_v14, %v96_v57  ;;  %v366_v61 = vadd.f32 %v364_v13, %v362_v50 }
  0x20   :  { %400 = vst [vmem:[%s565_s2 + $0x8] sm:$0xf] %v367_v21 }
  0x21   :  { %v278_v15 = vadd.f32 %v276_v53, %v188_v54 }
  0x23   :  { %v368_v35 = vadd.f32 %v366_v61, %v278_v15 }
  0x25   :  { %401 = vst [vmem:[%s565_s2 + $0xc] sm:$0xf] %v368_v35 }

</bundles_post_ra>
